<compile_context>
chip_gen: v7x
topology: tpu7x:2x2x1
jax: 0.10.0
libtpu: 0.0.40
codegen_flags: <defaults>
</compile_context>

<pallas_src>
import math
import functools

import jax
import jax.numpy as jnp
from jax.experimental import pallas as pl
from jax.experimental.pallas import tpu as pltpu

_BF16 = jnp.bfloat16


def _layernorm(v, g, b, eps=1e-5):
    mu = jnp.mean(v, axis=-1, keepdims=True)
    var = jnp.mean((v - mu) ** 2, axis=-1, keepdims=True)
    return (v - mu) * jax.lax.rsqrt(var + eps) * g + b


# ----------------------------------------------------------------------------------------
# Kernel 1: LayerNorm1 + fused QKV projection (one lane-dense (d, 3d) matmul).
# ----------------------------------------------------------------------------------------
def _qkv_proj_kernel(x_ref, ln1g_ref, ln1b_ref, wqkv_ref, bqkv_ref, qkv_ref):
    y = _layernorm(x_ref[0], ln1g_ref[0], ln1b_ref[0]).astype(_BF16)        # (TM, d)
    qkv = jnp.dot(y, wqkv_ref[...], preferred_element_type=jnp.float32)     # (TM, 3d) f32
    qkv_ref[0] = (qkv + bqkv_ref[0]).astype(_BF16)                          # lane-dense 3d store


# ----------------------------------------------------------------------------------------
# Kernel 2: attention (per query tile) + residual + LayerNorm2 + MLP + residual.
# ----------------------------------------------------------------------------------------
def _attn_mlp_kernel(n_heads, approx_gelu,
                     x_ref, mask_ref, q_ref, k_ref, v_ref,
                     wo_ref, bo_ref, ln2g_ref, ln2b_ref,
                     w1_ref, b1_ref, w2_ref, b2_ref,
                     out_ref):
    H = n_heads
    d = x_ref.shape[2]
    hd = d // H

    q = q_ref[0]                        # (TQ, d) bf16 — 1/sqrt(hd) already folded into Wq
    k = k_ref[0]                        # (N,  d) bf16
    v = v_ref[0]                        # (N,  d) bf16
    mask = mask_ref[0]                  # (1,  N) f32 additive key mask

    # Per-head attention. The QK^T / PV contractions are inherently per-head (block-diagonal
    # in d), so the head loop costs no extra MXU work; everything stays 2-D for robust
    # lowering. Softmax normalization is deferred past the PV matmul (scale (TQ, hd)).
    heads = []
    for h in range(H):
        lo, hi = h * hd, (h + 1) * hd
        qh, kh, vh = q[:, lo:hi], k[:, lo:hi], v[:, lo:hi]
        s = jax.lax.dot_general(qh, kh, (((1,), (1,)), ((), ())),
                                preferred_element_type=jnp.float32)          # (TQ, N) = Q K^T
        s = s + mask
        m = jnp.max(s, axis=-1, keepdims=True)
        e = jnp.exp(s - m)
        denom = jnp.sum(e, axis=-1, keepdims=True)
        pv = jnp.dot(e.astype(_BF16), vh, preferred_element_type=jnp.float32)  # (TQ, hd)
        pv = pv * pl.reciprocal(denom, approx=True)                          # EUP slot
        heads.append(pv.astype(_BF16))

    # Single lane-dense output projection on the head-concatenated result.
    o = heads[0] if H == 1 else jnp.concatenate(heads, axis=-1)              # (TQ, d) bf16
    attn = jnp.dot(o, wo_ref[...], preferred_element_type=jnp.float32) + bo_ref[0]

    x1 = x_ref[0] + attn                                                     # residual 1 (f32)

    # MLP (pre-norm). Exact erf GELU by default to match torch nn.GELU(); tanh GELU is
    # available behind a flag (routes to the EUP) at the cost of exact parity.
    z = _layernorm(x1, ln2g_ref[0], ln2b_ref[0]).astype(_BF16)
    h1 = jnp.dot(z, w1_ref[...], preferred_element_type=jnp.float32) + b1_ref[0]
    g = jax.nn.gelu(h1, approximate=approx_gelu)
    m2 = jnp.dot(g.astype(_BF16), w2_ref[...], preferred_element_type=jnp.float32) + b2_ref[0]

    out_ref[0] = (x1 + m2).astype(out_ref.dtype)                             # residual 2


# ----------------------------------------------------------------------------------------
# Wrapper
# ----------------------------------------------------------------------------------------
def _vmem_limit_bytes(need):
    """Size the scoped-VMEM request from actual residency, leaving Mosaic headroom."""
    try:
        cap = int(pltpu.get_tpu_info().vmem_capacity_bytes)     # 64 MiB v7x, 128 MiB v5e/v6e
    except Exception:
        cap = 64 << 20                                          # smallest across generations
    cap = min(cap, 128 << 20)
    return int(max(min(int(need), cap - (8 << 20)), 32 << 20))


def prepare_params(params, n_heads):
    """One-time parameter prep, hoisted out of the per-call path (review item): bf16 casts
    plus folding the 1/sqrt(head_dim) attention scale into the Q columns of Wqkv / bqkv."""
    d = params["wqkv"].shape[0]
    hd = d // n_heads
    scale = 1.0 / math.sqrt(hd)
    col_scale = jnp.concatenate([jnp.full((d,), scale, jnp.float32),
                                 jnp.ones((2 * d,), jnp.float32)])
    prepped = dict(params)
    prepped["wqkv_s"] = (params["wqkv"] * col_scale[None, :]).astype(_BF16)
    prepped["bqkv_s"] = (params["bqkv"].reshape(1, 3 * d) * col_scale[None, :]).astype(jnp.float32)
    prepped["wo_bf16"] = params["wo"].astype(_BF16)
    prepped["w1_bf16"] = params["w1"].astype(_BF16)
    prepped["w2_bf16"] = params["w2"].astype(_BF16)
    return prepped


def transformer_block(x, params, padding_mask=None, n_heads=1, q_tile=None, row_tile=None,
                      approx_gelu=False):
    """x: (B, N, d) float32; padding_mask: optional bool (B, N), True = padded key position.
    `params` must come from prepare_params()."""
    B, N, d = x.shape
    H = n_heads
    assert d % H == 0, "n_heads must divide d_model"
    hdim = params["w1_bf16"].shape[1]

    if q_tile is None:
        q_tile = min(N, 256)
    if row_tile is None:
        row_tile = min(N, 256)
    assert N % q_tile == 0 and N % row_tile == 0
    n_qt, n_rt = N // q_tile, N // row_tile

    if padding_mask is None:
        add_mask = jnp.zeros((B, 1, N), jnp.float32)
    else:
        add_mask = jnp.where(padding_mask, -1e9, 0.0).astype(jnp.float32).reshape(B, 1, N)

    # ---------------- kernel 1: LN1 + fused QKV projection ----------------
    per_br = lambda b, r: (b, r, 0)
    const2 = lambda b, r: (0, 0)

    need1 = (2 * (row_tile * d * 4 + row_tile * 3 * d * 2)          # x in / qkv out (dbl-buffered)
             + 2 * (d * 3 * d * 2 + 3 * d * 4 + 2 * d * 4)          # wqkv / bqkv / LN params
             + 4 * (row_tile * d * 2 + row_tile * 3 * d))           # live intermediates

    qkv = pl.pallas_call(
        _qkv_proj_kernel,
        out_shape=jax.ShapeDtypeStruct((B, N, 3 * d), _BF16),
        grid_spec=pltpu.PrefetchScalarGridSpec(
            num_scalar_prefetch=0,
            grid=(B, n_rt),
            in_specs=[pl.BlockSpec((1, row_tile, d), per_br),       # x row tile
                      pl.BlockSpec((1, d), const2),                 # ln1 gamma
                      pl.BlockSpec((1, d), const2),                 # ln1 beta
                      pl.BlockSpec((d, 3 * d), const2),             # Wqkv (bf16, Q cols pre-scaled)
                      pl.BlockSpec((1, 3 * d), const2)],            # bqkv (Q part pre-scaled)
            out_specs=pl.BlockSpec((1, row_tile, 3 * d), per_br)),
        compiler_params=pltpu.CompilerParams(
            dimension_semantics=("parallel", "parallel"),
            vmem_limit_bytes=_vmem_limit_bytes(2 * need1)),
    )(x, params["ln1_g"], params["ln1_b"], params["wqkv_s"], params["bqkv_s"])

    # ---------------- kernel 2: attention + residual + LN2 + MLP ----------------
    per_bq = lambda b, q: (b, q, 0)          # query tile of x / Q / output
    mask_map = lambda b, q: (b, 0, 0)
    k_map = lambda b, q: (b, 0, 1)           # columns [d, 2d) of qkv -> K (full sequence)
    v_map = lambda b, q: (b, 0, 2)           # columns [2d, 3d) of qkv -> V
    const2b = lambda b, q: (0, 0)

    need2 = (2 * (q_tile * d * 4 + N * 4 + q_tile * d * 2 + 2 * N * d * 2 + q_tile * d * 4)
             + 2 * 2 * (d * d + d * hdim + hdim * d)                # Wo / W1 / W2 (bf16, dbl-buffered)
             + 2 * 4 * (4 * d + hdim)                               # biases + LN params
             + 4 * (2 * q_tile * N + 2 * q_tile * hdim + 6 * q_tile * d))  # live activations

    kernel = functools.partial(_attn_mlp_kernel, H, approx_gelu)
    return pl.pallas_call(
        kernel,
        out_shape=jax.ShapeDtypeStruct((B, N, d), x.dtype),
        grid_spec=pltpu.PrefetchScalarGridSpec(
            num_scalar_prefetch=0,
            grid=(B, n_qt),
            in_specs=[pl.BlockSpec((1, q_tile, d), per_bq),         # x (residual, f32)
                      pl.BlockSpec((1, 1, N), mask_map),            # additive mask
                      pl.BlockSpec((1, q_tile, d), per_bq),         # Q tile   (qkv cols [0, d))
                      pl.BlockSpec((1, N, d), k_map),               # K full   (qkv cols [d, 2d))
                      pl.BlockSpec((1, N, d), v_map),               # V full   (qkv cols [2d, 3d))
                      pl.BlockSpec((d, d), const2b),                # Wo (bf16)
                      pl.BlockSpec((1, d), const2b),                # bo
                      pl.BlockSpec((1, d), const2b),                # ln2 gamma
                      pl.BlockSpec((1, d), const2b),                # ln2 beta
                      pl.BlockSpec((d, hdim), const2b),             # W1 (bf16)
                      pl.BlockSpec((1, hdim), const2b),             # b1
                      pl.BlockSpec((hdim, d), const2b),             # W2 (bf16)
                      pl.BlockSpec((1, d), const2b)],               # b2
            out_specs=pl.BlockSpec((1, q_tile, d), per_bq)),
        compiler_params=pltpu.CompilerParams(
            dimension_semantics=("parallel", "parallel"),
            vmem_limit_bytes=_vmem_limit_bytes(2 * need2)),
    )(x, add_mask, qkv, qkv, qkv,
      params["wo_bf16"], params["bo"],
      params["ln2_g"], params["ln2_b"],
      params["w1_bf16"], params["b1"], params["w2_bf16"], params["b2"])


# ----------------------------------------------------------------------------------------
# Parameters + pure-JAX reference
# ----------------------------------------------------------------------------------------
def init_params(key, d_model, mlp_ratio=4.0):
    hdim = int(d_model * mlp_ratio)
    ks = jax.random.split(key, 8)
    sd = 0.02
    return {
        "ln1_g": jnp.ones((1, d_model), jnp.float32),
        "ln1_b": jnp.zeros((1, d_model), jnp.float32),
        "wqkv": sd * jax.random.normal(ks[0], (d_model, 3 * d_model), jnp.float32),
        "bqkv": jnp.zeros((1, 3 * d_model), jnp.float32),
        "wo":   sd * jax.random.normal(ks[1], (d_model, d_model), jnp.float32),
        "bo":   jnp.zeros((1, d_model), jnp.float32),
        "ln2_g": jnp.ones((1, d_model), jnp.float32),
        "ln2_b": jnp.zeros((1, d_model), jnp.float32),
        "w1":   sd * jax.random.normal(ks[2], (d_model, hdim), jnp.float32),
        "b1":   jnp.zeros((1, hdim), jnp.float32),
        "w2":   sd * jax.random.normal(ks[3], (hdim, d_model), jnp.float32),
        "b2":   jnp.zeros((1, d_model), jnp.float32),
    }


def reference_block(x, p, padding_mask=None, n_heads=1):
    """Pure-JAX f32 reference for correctness checking."""
    B, N, d = x.shape
    hd = d // n_heads

    def ln(v, g, b):
        mu = v.mean(-1, keepdims=True)
        var = ((v - mu) ** 2).mean(-1, keepdims=True)
        return (v - mu) / jnp.sqrt(var + 1e-5) * g + b

    y = ln(x, p["ln1_g"][0], p["ln1_b"][0])
    qkv = y @ p["wqkv"] + p["bqkv"][0]
    q, k, v = jnp.split(qkv, 3, axis=-1)
    q = q.reshape(B, N, n_heads, hd).transpose(0, 2, 1, 3)
    k = k.reshape(B, N, n_heads, hd).transpose(0, 2, 1, 3)
    v = v.reshape(B, N, n_heads, hd).transpose(0, 2, 1, 3)
    s = jnp.einsum("bhqd,bhkd->bhqk", q, k) / math.sqrt(hd)
    if padding_mask is not None:
        s = s + jnp.where(padding_mask, -1e9, 0.0)[:, None, None, :]
    a = jax.nn.softmax(s, axis=-1)
    o = jnp.einsum("bhqk,bhkd->bhqd", a, v).transpose(0, 2, 1, 3).reshape(B, N, d)
    o = o @ p["wo"] + p["bo"][0]
    x1 = x + o
    z = ln(x1, p["ln2_g"][0], p["ln2_b"][0])
    m = jax.nn.gelu(z @ p["w1"] + p["b1"][0], approximate=False) @ p["w2"] + p["b2"][0]
    return x1 + m


if __name__ == "__main__":
    B, N, d_model, n_heads = 2, 128, 128, 2
    key = jax.random.PRNGKey(0)
    kx, kp = jax.random.split(key)

    x = jax.random.normal(kx, (B, N, d_model), jnp.float32)
    raw_params = init_params(kp, d_model, mlp_ratio=4.0)
    # one-time weight prep (bf16 cast + scale fold), hoisted out of the per-call path
    params = prepare_params(raw_params, n_heads)

    # pad out the last 32 key positions of batch element 1
    padding_mask = jnp.zeros((B, N), dtype=jnp.bool_).at[1, N - 32:].set(True)

    out = transformer_block(x, params, padding_mask=padding_mask,
                            n_heads=n_heads, q_tile=64)
    out = jax.block_until_ready(out)

    ref = reference_block(x, raw_params, padding_mask=padding_mask, n_heads=n_heads)
    assert out.shape == (B, N, d_model)
    max_err = float(jnp.max(jnp.abs(out - ref)))
    # bf16 MXU operands + approx reciprocal => loosened tolerance vs the f32 reference
    assert jnp.allclose(out, ref, atol=2e-2, rtol=2e-2), \
        f"mismatch vs reference (max abs err {max_err})"

    print("KERNEL_OK")
</pallas_src>

<mosaic_0001>
module attributes {stable_mosaic.version = 11 : i64} {
  func.func @_qkv_proj_kernel(%arg0: i32, %arg1: i32, %arg2: memref<1x128x128xf32, #tpu.memory_space<vmem>>, %arg3: memref<1x128xf32, #tpu.memory_space<vmem>>, %arg4: memref<1x128xf32, #tpu.memory_space<vmem>>, %arg5: memref<128x384xbf16, #tpu.memory_space<vmem>>, %arg6: memref<1x384xf32, #tpu.memory_space<vmem>>, %arg7: memref<1x128x384xbf16, #tpu.memory_space<vmem>>) attributes {dimension_semantics = [#tpu.dimension_semantics<parallel>, #tpu.dimension_semantics<parallel>], iteration_bounds = array<i64: 2, 1>, scalar_prefetch = 0 : i64, scratch_operands = 0 : i64, tpu.core_type = #tpu.core_type<tc>, window_params = [{transform_indices = @transform_0, window_bounds = array<i64: 1, 128, 128>}, {pipeline_mode = #tpu.pipeline_mode<synchronous>, transform_indices = @transform_1, window_bounds = array<i64: 1, 128>}, {pipeline_mode = #tpu.pipeline_mode<synchronous>, transform_indices = @transform_2, window_bounds = array<i64: 1, 128>}, {pipeline_mode = #tpu.pipeline_mode<synchronous>, transform_indices = @transform_3, window_bounds = array<i64: 128, 384>}, {pipeline_mode = #tpu.pipeline_mode<synchronous>, transform_indices = @transform_4, window_bounds = array<i64: 1, 384>}, {transform_indices = @transform_5, window_bounds = array<i64: 1, 128, 384>}]} {
    %c0 = arith.constant 0 : index
    %c0_0 = arith.constant 0 : index
    %c0_1 = arith.constant 0 : index
    %0 = vector.load %arg2[%c0, %c0_0, %c0_1] : memref<1x128x128xf32, #tpu.memory_space<vmem>>, vector<1x128x128xf32>
    %1 = vector.shape_cast %0 : vector<1x128x128xf32> to vector<128x128xf32>
    %c0_2 = arith.constant 0 : index
    %c0_3 = arith.constant 0 : index
    %2 = vector.load %arg3[%c0_2, %c0_3] : memref<1x128xf32, #tpu.memory_space<vmem>>, vector<1x128xf32>
    %3 = vector.shape_cast %2 : vector<1x128xf32> to vector<128xf32>
    %c0_4 = arith.constant 0 : index
    %c0_5 = arith.constant 0 : index
    %4 = vector.load %arg4[%c0_4, %c0_5] : memref<1x128xf32, #tpu.memory_space<vmem>>, vector<1x128xf32>
    %5 = vector.shape_cast %4 : vector<1x128xf32> to vector<128xf32>
    %cst = arith.constant dense<0.000000e+00> : vector<128xf32>
    %6 = vector.multi_reduction <add>, %1, %cst [1] : vector<128x128xf32> to vector<128xf32>
    %7 = vector.shape_cast %6 : vector<128xf32> to vector<128x1xf32>
    %cst_6 = arith.constant 1.280000e+02 : f32
    %8 = vector.broadcast %cst_6 : f32 to vector<128x1xf32>
    %9 = arith.divf %7, %8 : vector<128x1xf32>
    %10 = vector.broadcast %9 : vector<128x1xf32> to vector<128x128xf32>
    %11 = arith.subf %1, %10 : vector<128x128xf32>
    %12 = arith.mulf %11, %11 : vector<128x128xf32>
    %cst_7 = arith.constant dense<0.000000e+00> : vector<128xf32>
    %13 = vector.multi_reduction <add>, %12, %cst_7 [1] : vector<128x128xf32> to vector<128xf32>
    %14 = vector.shape_cast %13 : vector<128xf32> to vector<128x1xf32>
    %cst_8 = arith.constant 1.280000e+02 : f32
    %15 = vector.broadcast %cst_8 : f32 to vector<128x1xf32>
    %16 = arith.divf %14, %15 : vector<128x1xf32>
    %17 = vector.broadcast %9 : vector<128x1xf32> to vector<128x128xf32>
    %18 = arith.subf %1, %17 : vector<128x128xf32>
    %cst_9 = arith.constant 9.99999974E-6 : f32
    %19 = vector.broadcast %cst_9 : f32 to vector<128x1xf32>
    %20 = arith.addf %16, %19 : vector<128x1xf32>
    %21 = math.rsqrt %20 : vector<128x1xf32>
    %22 = vector.broadcast %21 : vector<128x1xf32> to vector<128x128xf32>
    %23 = arith.mulf %18, %22 : vector<128x128xf32>
    %24 = vector.shape_cast %3 : vector<128xf32> to vector<1x128xf32>
    %25 = vector.broadcast %24 : vector<1x128xf32> to vector<128x128xf32>
    %26 = arith.mulf %23, %25 : vector<128x128xf32>
    %27 = vector.shape_cast %5 : vector<128xf32> to vector<1x128xf32>
    %28 = vector.broadcast %27 : vector<1x128xf32> to vector<128x128xf32>
    %29 = arith.addf %26, %28 : vector<128x128xf32>
    %30 = arith.truncf %29 : vector<128x128xf32> to vector<128x128xbf16>
    %c0_10 = arith.constant 0 : index
    %c0_11 = arith.constant 0 : index
    %31 = vector.load %arg5[%c0_10, %c0_11] : memref<128x384xbf16, #tpu.memory_space<vmem>>, vector<128x384xbf16>
    %cst_12 = arith.constant dense<0.000000e+00> : vector<128x384xf32>
    %32 = tpu.matmul %30, %31, %cst_12 {dimension_numbers = #tpu.dot_dimension_numbers<[1], [0], [0], [1], [0, 0, 1, 1], [], []>} : vector<128x128xbf16>, vector<128x384xbf16>, vector<128x384xf32> -> vector<128x384xf32>
    %c0_13 = arith.constant 0 : index
    %c0_14 = arith.constant 0 : index
    %33 = vector.load %arg6[%c0_13, %c0_14] : memref<1x384xf32, #tpu.memory_space<vmem>>, vector<1x384xf32>
    %34 = vector.shape_cast %33 : vector<1x384xf32> to vector<384xf32>
    %35 = vector.shape_cast %34 : vector<384xf32> to vector<1x384xf32>
    %36 = vector.broadcast %35 : vector<1x384xf32> to vector<128x384xf32>
    %37 = arith.addf %32, %36 : vector<128x384xf32>
    %38 = arith.truncf %37 : vector<128x384xf32> to vector<128x384xbf16>
    %c0_15 = arith.constant 0 : index
    %c0_16 = arith.constant 0 : index
    %c0_17 = arith.constant 0 : index
    %39 = vector.load %arg7[%c0_15, %c0_16, %c0_17] : memref<1x128x384xbf16, #tpu.memory_space<vmem>>, vector<1x128x384xbf16>
    %40 = vector.shape_cast %39 : vector<1x128x384xbf16> to vector<128x384xbf16>
    %41 = vector.shape_cast %38 : vector<128x384xbf16> to vector<1x128x384xbf16>
    tpu.vector_store %arg7[%c0_15, %c0_16, %c0_17], %41 {strides = array<i32>} : memref<1x128x384xbf16, #tpu.memory_space<vmem>>, vector<1x128x384xbf16>,
    return
  }
  func.func @transform_0(%arg0: i32, %arg1: i32) -> (i32, i32, i32) {
    %c0_i32 = arith.constant 0 : i32
    %c0_i32_0 = arith.constant 0 : i32
    return %arg0, %arg1, %c0_i32 : i32, i32, i32
  }
  func.func @transform_1(%arg0: i32, %arg1: i32) -> (i32, i32) {
    %c0_i32 = arith.constant 0 : i32
    %c0_i32_0 = arith.constant 0 : i32
    %c0_i32_1 = arith.constant 0 : i32
    return %c0_i32, %c0_i32_0 : i32, i32
  }
  func.func @transform_2(%arg0: i32, %arg1: i32) -> (i32, i32) {
    %c0_i32 = arith.constant 0 : i32
    %c0_i32_0 = arith.constant 0 : i32
    %c0_i32_1 = arith.constant 0 : i32
    return %c0_i32, %c0_i32_0 : i32, i32
  }
  func.func @transform_3(%arg0: i32, %arg1: i32) -> (i32, i32) {
    %c0_i32 = arith.constant 0 : i32
    %c0_i32_0 = arith.constant 0 : i32
    %c0_i32_1 = arith.constant 0 : i32
    return %c0_i32, %c0_i32_0 : i32, i32
  }
  func.func @transform_4(%arg0: i32, %arg1: i32) -> (i32, i32) {
    %c0_i32 = arith.constant 0 : i32
    %c0_i32_0 = arith.constant 0 : i32
    %c0_i32_1 = arith.constant 0 : i32
    return %c0_i32, %c0_i32_0 : i32, i32
  }
  func.func @transform_5(%arg0: i32, %arg1: i32) -> (i32, i32, i32) {
    %c0_i32 = arith.constant 0 : i32
    %c0_i32_0 = arith.constant 0 : i32
    return %arg0, %arg1, %c0_i32 : i32, i32, i32
  }
}

</mosaic_0001>

<bundles_post_ra>
// kernel: tpu_custom_call.1
= control target key start
LH: loop header
LB: loop body
LE: loop exit
PB: predicated region body
PF: predicated region fallthrough
CT: control target
= control target key end

     0   :  { %10 = vsyncpa [#allocation3], 0  ;;  %s2200_s0 = inlined_call_operand.hbm [shape: f32[2,128,128], index: 0, kind: input, shape index: {}]   ;;  %s2201_s1 = inlined_call_operand.vmem [shape: f32[1,128], index: 1, kind: input, shape index: {}]   ;;  %s2202_s2 = inlined_call_operand.vmem [shape: f32[1,128], index: 2, kind: input, shape index: {}]   ;;  %s2203_s3 = inlined_call_operand.hbm [shape: bf16[128,384], index: 3, kind: input, shape index: {}]   ;;  %s2204_s4 = inlined_call_operand.vmem [shape: f32[1,384], index: 4, kind: input, shape index: {}]   ;;  %s2205_s5 = inlined_call_operand.hbm [shape: bf16[2,128,384], index: 5, kind: output, shape index: {}]  }
   0x1   :  { %12 = vsyncpa [#allocation3 + $0x1], 0 }
   0x2   :  { %13 = vsyncpa [#allocation6], 0 }
   0x3   :  { %14 = vsyncpa [#allocation4], 0 }
   0x4   :  { %16 = vsyncpa [#allocation4 + $0x1], 0  ;;  %s1704_s18 = smov 0   ;;  %s1706_s19 = smov 0  }
   0x5   :  { %s1708_s20 = smov 0   ;;  %s1710_s21 = smov 0  }
   0x6   :  { %s1712_s22 = smov 0   ;;  %s1714_s23 = smov 0  }
   0x7 LB: > { %s1219_s24 = sadd.s32 4294967295, %s1662_s23   ;;  %s1220_s25 = sadd.s32 4294967294, %s1662_s23   ;;  %s1662_s23 = sphi %s1714_s23, %s22_s23   ;;  %s1658_s22 = sphi %s1712_s22, %s2229_s22   ;;  %s1654_s21 = sphi %s1710_s21, %s2228_s21   ;;  %s1650_s20 = sphi %s1708_s20, %s2227_s20   ;;  %s1646_s19 = sphi %s1706_s19, %s2226_s19   ;;  %s1642_s18 = sphi %s1704_s18, %s2225_s18  }
   0x8   : > { %p56_p0 = scmp.ne.s32.totalorder %s1646_s19, %s1642_s18  ;;  %p1738_p1 = scmp.eq.s32.totalorder %s1219_s24, 0 }
   0x9   : > { %p1742_p2 = scmp.eq.s32.totalorder %s1219_s24, 1  ;;  %p172_p3 = scmp.eq.s32.totalorder %s1220_s25, 1 }
   0xa   : > { %s2210_s26 = scalar_select %p1738_p1, 1, 0 }
   0xb   : > { %s2211_s27 = scalar_select %p1742_p2, 1, 0 }
   0xc   : > { %p1748_p4 = por %p1738_p1, %p56_p0  ;;  %p1221_p5 = scmp.ge.s32.totalorder %s1662_s23, 1 }
   0xd   : > { %p1753_p6 = por %p172_p3, %p56_p0  ;;  %p179_p7 = scmp.lt.s32.totalorder %s1662_s23, 3 }
   0xe   : > { %s2212_s28 = scalar_select %p1748_p4, 1, 0 }
   0xf   : > { %s2213_s29 = scalar_select %p1753_p6, 1, 0 }
  0x10   : > { %p1758_p8 = pnand %p1221_p5, %p179_p7  ;;  %s1664_s6 = smov [#allocation5]  }
  0x11   : > { %s197_s7 = sshll.u32 %s1664_s6, 4  ;;  %s34_s9 = sadd.s32 1, %s1658_s22  ;;  %s198_s7 = int_to_ptr.vmem [resolvable:$true] %s197_s7 }
  0x12   : > { %s2214_s30 = scalar_select %p1758_p8, 1, 0 }
  0x13   : > { %p1382_p9 = pneg %p1758_p8  ;;  %s1518_s12 = scalar_lea.hbm %s2203_s3, 3072 }
  0x14   : > { %p1519_p12 = scmp.ne.s32.totalorder %s2203_s3, %s1518_s12  ;;  %p1525_p5 = scmp.lt.u32.totalorder %s1518_s12, %s2203_s3 }
  0x15   : > { %p1767_p11 = pnand %p1382_p9, %p1738_p1 }
  0x17   : > { %p1520_p13 = pneg %p1767_p11 }
  0x19   : > { %p1521_p0 = pnand %p1520_p13, %p1519_p12 }
  0x1b   : > { %p1522_p3 = pneg %p1521_p0 }
  0x1d   : > { %p1527_p7 = pnand %p1525_p5, %p1522_p3 }
  0x1f   : > { %1530 = shalt.err (!%p1527_p7)
}
  0x20   : > { %s1531_s17 = scalar_lea.vmem %s198_s7, 3072  ;;  %p1539_p1 = scmp.lt.s32.totalorder %s198_s7, %s198_s7 }
  0x21   : > { %p1532_p9 = scmp.ne.s32.totalorder %s198_s7, %s1531_s17  ;;  %p1540_p4 = scmp.lt.s32.totalorder %s1531_s17, %s1531_s17 }
  0x23   : > { %p1534_p10 = pnand %p1532_p9, %p1520_p13  ;;  %p1541_p8 = por %p1540_p4, %p1539_p1 }
  0x25   : > { %p1535_p6 = pneg %p1534_p10 }
  0x27   : > { %p1542_p2 = pnand %p1541_p8, %p1535_p6 }
  0x29   : > { %1545 = shalt.err (!%p1542_p2)
}
  0x2a   : > { %s1665_s24 = smov 192   ;;  %s1666_s25 = smov 12  }
  0x2b   : > { %1385 = dma.hbm_to_vmem [thread:$0]  (!%p1767_p11), %s2203_s3, 3072, %s198_s7, [#allocation6], %s1665_s24, %s1665_s24, %s1666_s25  }
  0x2c   : > { %p36_p1 = scmp.ge.s32.totalorder %s34_s9, 2  ;;  %s43_s11 = sadd.s32 1, %s1650_s20 }
  0x2d   : > { %p50_p2 = scmp.ne.s32.totalorder %s1650_s20, %s1646_s19  ;;  %p51_p4 = scmp.eq.s32.totalorder %s1662_s23, 0 }
  0x2e   : > { %s2231_s9 = smov (%p36_p1, %s34_s9), 0  ;;  %p2217_p8 = scmp.ne.s32.totalorder %s2211_s27, 0 }
  0x2f   : > { %p1794_p6 = por %p51_p4, %p50_p2  ;;  %s38_s8 = ssub.s32 %s1658_s22, %s2231_s9 }
  0x30   : > { %p1800_p10 = por %p2217_p8, %p50_p2  ;;  %p1395_p12 = scmp.lt.s32.totalorder %s1662_s23, 2 }
  0x31   : > { %p41_p11 = scmp.eq.s32.totalorder %s38_s8, 0  ;;  %s214_s7 = sand.u32 1, %s1650_s20  }
  0x32   : > { %s1224_s14 = sshll.u32 %s214_s7, 7  ;;  %s1291_s16 = sshll.u32 %s1658_s22, 11 }
  0x33   : > { %s1809_s15 = scalar_select %p41_p11, %s1650_s20, %s43_s11  }
  0x34   : > { %s1815_s25 = scalar_lea.hbm %s2200_s0, %s1291_s16  ;;  %s218_s27 = scalar_lea.vmem [#allocation2], %s1224_s14 }
  0x35   : > { %s227_s6 = sshll.u32 %s218_s27, 4  ;;  %p1821_p13 = pnand %p1395_p12, %p1794_p6  ;;  %s1817_s6 = int_to_ptr.vmem [resolvable:$true] %s227_s6 }
  0x36   : > { %s1825_s11 = scalar_lea.sflag [#allocation3], %s214_s7  ;;  %s1546_s8 = scalar_lea.hbm %s1815_s25, 2048 }
  0x37   : > { %p1547_p0 = scmp.ne.s32.totalorder %s1815_s25, %s1546_s8  ;;  %p1548_p3 = pneg %p1821_p13 }
  0x38   : > { %s1551_s12 = scalar_lea.hbm %s2200_s0, 4096  ;;  %p1552_p9 = scmp.lt.u32.totalorder %s1815_s25, %s2200_s0 }
  0x39   : > { %p1549_p5 = pnand %p1548_p3, %p1547_p0  ;;  %p1553_p1 = scmp.lt.u32.totalorder %s1551_s12, %s1546_s8 }
  0x3a   : > { %p1555_p4 = scmp.lt.u32.totalorder %s1546_s8, %s1815_s25 }
  0x3b   : > { %p1550_p7 = pneg %p1549_p5  ;;  %p1554_p2 = por %p1553_p1, %p1552_p9 }
  0x3d   : > { %p1556_p6 = por %p1555_p4, %p1554_p2 }
  0x3f   : > { %p1557_p8 = pnand %p1556_p6, %p1550_p7 }
  0x41   : > { %1560 = shalt.err (!%p1557_p8)
}
  0x42   : > { %s1561_s7 = scalar_lea.vmem %s1817_s6, 2048  ;;  %s1667_s27 = smov [#allocation2]  }
  0x43   : > { %p1562_p12 = scmp.ne.s32.totalorder %s1817_s6, %s1561_s7  ;;  %s1566_s14 = sshll.u32 %s1667_s27, 4  ;;  %s1567_s14 = int_to_ptr.vmem [resolvable:$false] %s1566_s14 }
  0x44   : > { %s1568_s16 = scalar_lea.vmem %s1567_s14, 4096  ;;  %p1569_p5 = scmp.lt.s32.totalorder %s1817_s6, %s1567_s14 }
  0x45   : > { %p1564_p11 = pnand %p1562_p12, %p1548_p3  ;;  %p1570_p9 = scmp.lt.s32.totalorder %s1568_s16, %s1561_s7 }
  0x47   : > { %p1565_p0 = pneg %p1564_p11  ;;  %p1571_p1 = por %p1570_p9, %p1569_p5 }
  0x49   : > { %p1572_p2 = pnand %p1571_p1, %p1565_p0 }
  0x4b   : > { %1575 = shalt.err (!%p1572_p2)
}
  0x4c   : > { %s1668_s8 = smov 128   ;;  %s1669_s12 = smov 8  }
  0x4d   : > { %1389 = dma.hbm_to_vmem [thread:$0]  (!%p1821_p13), %s1815_s25, 2048, %s1817_s6, %s1825_s11, %s1668_s8, %s1668_s8, %s1669_s12  }
  0x4e   : > { %p2220_p3 = scmp.ne.s32.totalorder %s2214_s30, 0 }
  0x4f   : > { %s1856_s17 = sand.u32 (!%p2220_p3), 1, %s1646_s19   ;;  %p2221_p7 = scmp.ne.s32.totalorder (!%p2220_p3), %s2212_s28, 0 }
  0x50   : > { %239 = sbr.rel (%p2220_p3) target bundleno = 699 (0x2bb), region = 40  ;;  %s1228_s24 = sshll.u32 (!%p2220_p3), %s1856_s17, 7 }
  0x51   : > { %s242_s7 = scalar_lea.sflag (!%p2220_p3), [#allocation3], %s1856_s17  ;;  %s1860_s27 = scalar_lea.vmem (!%p2220_p3), [#allocation2], %s1228_s24 }
  0x57   : > { %1629 = dma.done.wait (%p2221_p7), %s242_s7, 2048  }
  0x58   : > { %1631 = vsyncadd (%p2221_p7), %s242_s7, 4294965248  ;;  %p2222_p13 = scmp.ne.s32.totalorder %s2210_s26, 0 }
  0x5a   : > { %1633 = dma.done.wait (%p2222_p13), [#allocation6], 3072  }
  0x5b   : > { %1635 = vsyncadd (%p2222_p13), [#allocation6], 4294964224  ;;  %v279_v0 = vld [vmem:[%s1860_s27] sm:$0xff]  ;;  %v281_v1 = vld [vmem:[%s1860_s27 + $0x10] sm:$0xff]  ;;  %s1372_s11 = smul.u32 192, %s1856_s17  ;;  %s1671_s26 = smov [#allocation7]  }
  0x5c   : > { %297 = vadd.xlane.f32.xlu0 %v279_v0  ;;  %301 = vadd.xlane.f32.xlu1 %v281_v1  ;;  %v280_v2 = vld [vmem:[%s1860_s27 + $0x8] sm:$0xff]  ;;  %v282_v3 = vld [vmem:[%s1860_s27 + $0x18] sm:$0xff]  ;;  %v283_v4 = vld [vmem:[%s1860_s27 + $0x20] sm:$0xff]  ;;  %s1373_s16 = smul.u32 3072, %s1654_s21  ;;  %s1106_s21 = scalar_lea.sflag [#allocation4], %s1856_s17 }
  0x5d   : > { %v284_v5 = vld [vmem:[%s1860_s27 + $0x28] sm:$0xff]  ;;  %v285_v6 = vld [vmem:[%s1860_s27 + $0x30] sm:$0xff]  ;;  %v1878_v7 = vld [vmem:[%s1860_s27 + $0x38] sm:$0xff]  ;;  %s2067_s14 = scalar_lea.vmem [#allocation7], %s1372_s11  ;;  %s1580_s28 = sshll.u32 %s1671_s26, 4  ;;  %s1581_s28 = int_to_ptr.vmem [resolvable:$false] %s1580_s28 }
  0x5e   : > { %v1881_v8 = vld [vmem:[%s1860_s27 + $0x40] sm:$0xff]  ;;  %v1884_v9 = vld [vmem:[%s1860_s27 + $0x48] sm:$0xff]  ;;  %v1890_v10 = vld [vmem:[%s1860_s27 + $0x50] sm:$0xff]  ;;  %s1122_s8 = sshll.u32 %s2067_s14, 4  ;;  %s2147_s7 = scalar_lea.hbm %s2205_s5, %s1373_s16  ;;  %s2150_s8 = int_to_ptr.vmem [resolvable:$true] %s1122_s8 }
  0x5f   : > { %v1893_v11 = vld [vmem:[%s1860_s27 + $0x58] sm:$0xff]  ;;  %v1898_v12 = vld [vmem:[%s1860_s27 + $0x60] sm:$0xff]  ;;  %v1901_v13 = vld [vmem:[%s1860_s27 + $0x68] sm:$0xff]  ;;  %s1582_s30 = scalar_lea.vmem %s1581_s28, 6144  ;;  %p1583_p12 = scmp.lt.s32.totalorder %s2150_s8, %s1581_s28 }
  0x60   : > { %299 = vadd.xlane.f32.xlu0 %v280_v2  ;;  %303 = vadd.xlane.f32.xlu1 %v282_v3  ;;  %v1906_v14 = vld [vmem:[%s1860_s27 + $0x70] sm:$0xff]  ;;  %v1909_v15 = vld [vmem:[%s1860_s27 + $0x78] sm:$0xff]  ;;  %v1456_v17 = vld [vmem:[#allocation5] ss:$12 sps:$4 sm:$0xff]   ;;  %s1576_s27 = scalar_lea.vmem %s2150_s8, 3072 }
  0x61   : > { %v1454_v16 = vld [vmem:[#allocation5 + $0x4] ss:$12 sps:$4 sm:$0xff]   ;;  %v1457_v18 = vld [vmem:[#allocation5 + $0x1c] ss:$12 sps:$4 sm:$0xff]   ;;  %p1577_p4 = scmp.ne.s32.totalorder %s2150_s8, %s1576_s27  ;;  %p1584_p11 = scmp.lt.s32.totalorder %s1582_s30, %s1576_s27 }
  0x62   : > { %v1459_v19 = vld [vmem:[#allocation5 + $0x8] ss:$12 sps:$4 sm:$0xff]   ;;  %703 = vmatprep.subr.bf16.mxu0 %v1454_v16  ;;  %v1460_v58 = vld [vmem:[#allocation5 + $0x18] ss:$12 sps:$4 sm:$0xff]  }
  0x63   : > { %704 = vmatpush1.bf16.msra.mxu0 %v1456_v17  ;;  %1340 = vmatprep.subr.bf16.mxu1 %v1459_v19  ;;  %p1578_p6 = pnand %p1577_p4, %p1800_p10  ;;  %p1585_p0 = por %p1584_p11, %p1583_p12 }
  0x64   : > { %305 = vadd.xlane.f32.xlu0 %v283_v4  ;;  %307 = vadd.xlane.f32.xlu1 %v284_v5 }
  0x65   : > { %705 = vmatprep.subr.bf16.mxu0 %v1457_v18  ;;  %1341 = vmatpush3.bf16.msra.mxu1 %v1459_v19  ;;  %v1465_v18 = vld [vmem:[#allocation5 + $0x4c] ss:$12 sps:$4 sm:$0xff]   ;;  %p1579_p8 = pneg %p1578_p6 }
  0x66   : > { %v1467_v19 = vld [vmem:[#allocation5 + $0x38] ss:$12 sps:$4 sm:$0xff]  }
  0x67   : > { %706 = vmatpush1.bf16.msra.mxu0 %v1460_v58  ;;  %p1586_p5 = pnand %p1585_p0, %p1579_p8 }
  0x68   : > { %309 = vadd.xlane.f32.xlu0 %v285_v6  ;;  %311 = vadd.xlane.f32.xlu1 %v1878_v7 }
  0x6c   : > { %313 = vadd.xlane.f32.xlu0 %v1881_v8  ;;  %315 = vadd.xlane.f32.xlu1 %v1884_v9 }
  0x70   : > { %317 = vadd.xlane.f32.xlu0 %v1890_v10  ;;  %319 = vadd.xlane.f32.xlu1 %v1893_v11 }
  0x74   : > { %321 = vadd.xlane.f32.xlu0 %v1898_v12  ;;  %323 = vadd.xlane.f32.xlu1 %v1901_v13 }
  0x78   : > { %325 = vadd.xlane.f32.xlu0 %v1906_v14  ;;  %327 = vadd.xlane.f32.xlu1 %v1909_v15 }
  0xe9   : > { %v298_v20 = vpop.xlane.xlu0 %297  ;;  %v302_v21 = vpop.xlane.xlu1 %301 }
  0xea   : > { %v330_v22 = vmul.f32 0.0078125, %v298_v20  ;;  %v332_v23 = vmul.f32 0.0078125, %v302_v21 }
  0xec   : > { %v1913_v24 = vsub.f32 %v279_v0, %v330_v22  ;;  %v1915_v25 = vsub.f32 %v281_v1, %v332_v23  ;;  %v1461_v0 = vld [vmem:[#allocation5 + $0x34] ss:$12 sps:$4 sm:$0xff]  }
  0xed   : > { %v300_v26 = vpop.xlane.xlu0 %299  ;;  %v304_v27 = vpop.xlane.xlu1 %303  ;;  %v1463_v1 = vld [vmem:[#allocation5 + $0x20] ss:$12 sps:$4 sm:$0xff]   ;;  %707 = vmatprep.subr.bf16.mxu0 %v1461_v0  ;;  %v1468_v22 = vld [vmem:[#allocation5 + $0x48] ss:$12 sps:$4 sm:$0xff]  }
  0xee   : > { %v331_v28 = vmul.f32 0.0078125, %v300_v26  ;;  %v362_v29 = vmul.f32 %v1913_v24, %v1913_v24  ;;  %v333_v30 = vmul.f32 0.0078125, %v304_v27  ;;  %v364_v33 = vmul.f32 %v1915_v25, %v1915_v25  ;;  %1342 = vmatprep.subr.bf16.mxu1 %v1463_v1 }
  0xef   : > { %1343 = vmatpush3.bf16.msra.mxu1 %v1463_v1 }
  0xf0   : > { %v1919_v31 = vsub.f32 %v280_v2, %v331_v28  ;;  %378 = vadd.xlane.f32.xlu0 %v362_v29  ;;  %v1921_v32 = vsub.f32 %v282_v3, %v333_v30  ;;  %1344 = vmatprep.subr.bf16.mxu1 %v1467_v19  ;;  %v1469_v29 = vld [vmem:[#allocation5 + $0x64] ss:$12 sps:$4 sm:$0xff]  }
  0xf1   : > { %v306_v34 = vpop.xlane.xlu0 %305  ;;  %v308_v35 = vpop.xlane.xlu1 %307  ;;  %v1471_v30 = vld [vmem:[#allocation5 + $0x50] ss:$12 sps:$4 sm:$0xff]  }
  0xf2   : > { %v334_v36 = vmul.f32 0.0078125, %v306_v34  ;;  %v363_v37 = vmul.f32 %v1919_v31, %v1919_v31  ;;  %v335_v38 = vmul.f32 0.0078125, %v308_v35  ;;  %v365_v41 = vmul.f32 %v1921_v32, %v1921_v32  ;;  %v1475_v35 = vld [vmem:[#allocation5 + $0x68] ss:$12 sps:$4 sm:$0xff]  }
  0xf3   : > { %1345 = vmatpush3.bf16.msra.mxu1 %v1467_v19 }
  0xf4   : > { %v1927_v39 = vsub.f32 %v283_v4, %v334_v36  ;;  %382 = vadd.xlane.f32.xlu0 %v364_v33  ;;  %380 = vadd.xlane.f32.xlu1 %v363_v37  ;;  %v1929_v40 = vsub.f32 %v284_v5, %v335_v38  ;;  %v1472_v33 = vld [vmem:[#allocation5 + $0x60] ss:$12 sps:$4 sm:$0xff]   ;;  %v1476_v36 = vld [vmem:[#allocation5 + $0x78] ss:$12 sps:$4 sm:$0xff]  }
  0xf5   : > { %v310_v42 = vpop.xlane.xlu0 %309  ;;  %v312_v43 = vpop.xlane.xlu1 %311  ;;  %1346 = vmatprep.subr.bf16.mxu1 %v1471_v30  ;;  %v1477_v37 = vld [vmem:[#allocation5 + $0x94] ss:$12 sps:$4 sm:$0xff]  }
  0xf6   : > { %v336_v44 = vmul.f32 0.0078125, %v310_v42  ;;  %v366_v45 = vmul.f32 %v1927_v39, %v1927_v39  ;;  %v337_v46 = vmul.f32 0.0078125, %v312_v43  ;;  %v367_v49 = vmul.f32 %v1929_v40, %v1929_v40  ;;  %v1479_v38 = vld [vmem:[#allocation5 + $0x80] ss:$12 sps:$4 sm:$0xff]   ;;  %v1483_v43 = vld [vmem:[#allocation5 + $0x98] ss:$12 sps:$4 sm:$0xff]  }
  0xf7   : > { %1347 = vmatpush3.bf16.msra.mxu1 %v1471_v30  ;;  %v1481_v42 = vld [vmem:[#allocation5 + $0xac] ss:$12 sps:$4 sm:$0xff]  }
  0xf8   : > { %v1935_v47 = vsub.f32 %v285_v6, %v336_v44  ;;  %384 = vadd.xlane.f32.xlu1 %v365_v41  ;;  %386 = vadd.xlane.f32.xlu0 %v366_v45  ;;  %v1938_v48 = vsub.f32 %v1878_v7, %v337_v46  ;;  %v1464_v7 = vld [vmem:[#allocation5 + $0x30] ss:$12 sps:$4 sm:$0xff]   ;;  %v1484_v44 = vld [vmem:[#allocation5 + $0xa8] ss:$12 sps:$4 sm:$0xff]   ;;  %v1670_v46 = vmov 0  }
  0xf9   : > { %v314_v50 = vpop.xlane.xlu0 %313  ;;  %v316_v51 = vpop.xlane.xlu1 %315  ;;  %708 = vmatpush1.bf16.msra.mxu0 %v1464_v7  ;;  %1348 = vmatprep.subr.bf16.mxu1 %v1475_v35  ;;  %v1480_v41 = vld [vmem:[#allocation5 + $0x90] ss:$12 sps:$4 sm:$0xff]  }
  0xfa   : > { %v338_v52 = vmul.f32 0.0078125, %v314_v50  ;;  %v368_v53 = vmul.f32 %v1935_v47, %v1935_v47  ;;  %v339_v54 = vmul.f32 0.0078125, %v316_v51  ;;  %v369_v57 = vmul.f32 %v1938_v48, %v1938_v48  ;;  %709 = vmatprep.subr.bf16.mxu0 %v1465_v18  ;;  %v1485_v45 = vld [vmem:[#allocation5 + $0xb0] ss:$12 sps:$4 sm:$0xff]   ;;  %735 = vmatprep.mubr.bf16.mxu0 %v1670_v46 }
  0xfb   : > { %1349 = vmatpush3.bf16.msra.mxu1 %v1475_v35 }
  0xfc   : > { %v1945_v55 = vsub.f32 %v1881_v8, %v338_v52  ;;  %388 = vadd.xlane.f32.xlu1 %v367_v49  ;;  %390 = vadd.xlane.f32.xlu0 %v368_v53  ;;  %v1948_v56 = vsub.f32 %v1884_v9, %v339_v54 }
  0xfd   : > { %v318_v59 = vpop.xlane.xlu0 %317  ;;  %v320_v60 = vpop.xlane.xlu1 %319  ;;  %710 = vmatpush1.bf16.msra.mxu0 %v1468_v22  ;;  %1350 = vmatprep.subr.bf16.mxu1 %v1479_v38  ;;  %v1991_v22 = vld [vmem:[%s2201_s1] ss:$0 sm:$0xff] }
  0xfe   : > { %v340_v61 = vmul.f32 0.0078125, %v318_v59  ;;  %v370_v62 = vmul.f32 %v1945_v55, %v1945_v55  ;;  %v341_v63 = vmul.f32 0.0078125, %v320_v60  ;;  %v371_v4 = vmul.f32 %v1948_v56, %v1948_v56  ;;  %711 = vmatprep.subr.bf16.mxu0 %v1469_v29 }
  0xff   : > { %1351 = vmatpush3.bf16.msra.mxu1 %v1479_v38 }
 0x100   : > { %v1955_v2 = vsub.f32 %v1890_v10, %v340_v61  ;;  %392 = vadd.xlane.f32.xlu1 %v369_v57  ;;  %394 = vadd.xlane.f32.xlu0 %v370_v62  ;;  %v1958_v3 = vsub.f32 %v1893_v11, %v341_v63 }
 0x101   : > { %v322_v5 = vpop.xlane.xlu0 %321  ;;  %v324_v6 = vpop.xlane.xlu1 %323  ;;  %712 = vmatpush1.bf16.msra.mxu0 %v1472_v33  ;;  %1352 = vmatprep.subr.bf16.mxu1 %v1483_v43 }
 0x102   : > { %v342_v8 = vmul.f32 0.0078125, %v322_v5  ;;  %v372_v9 = vmul.f32 %v1955_v2, %v1955_v2  ;;  %v343_v16 = vmul.f32 0.0078125, %v324_v6  ;;  %v373_v17 = vmul.f32 %v1958_v3, %v1958_v3 }
 0x103   : > { %1353 = vmatpush3.bf16.msra.mxu1 %v1483_v43 }
 0x104   : > { %v1965_v10 = vsub.f32 %v1898_v12, %v342_v8  ;;  %396 = vadd.xlane.f32.xlu1 %v371_v4  ;;  %398 = vadd.xlane.f32.xlu0 %v372_v9  ;;  %v1968_v11 = vsub.f32 %v1901_v13, %v343_v16 }
 0x105   : > { %v326_v20 = vpop.xlane.xlu0 %325  ;;  %v328_v21 = vpop.xlane.xlu1 %327  ;;  %1354 = vmatprep.subr.bf16.mxu1 %v1485_v45 }
 0x106   : > { %v344_v23 = vmul.f32 0.0078125, %v326_v20  ;;  %v374_v26 = vmul.f32 %v1965_v10, %v1965_v10  ;;  %v345_v27 = vmul.f32 0.0078125, %v328_v21  ;;  %v375_v28 = vmul.f32 %v1968_v11, %v1968_v11 }
 0x107   : > { %1355 = vmatpush3.bf16.msra.mxu1 %v1485_v45 }
 0x108   : > { %v1975_v12 = vsub.f32 %v1906_v14, %v344_v23  ;;  %400 = vadd.xlane.f32.xlu1 %v373_v17  ;;  %402 = vadd.xlane.f32.xlu0 %v374_v26  ;;  %v1978_v13 = vsub.f32 %v1909_v15, %v345_v27  ;;  %v1473_v15 = vld [vmem:[#allocation5 + $0x7c] ss:$12 sps:$4 sm:$0xff]  }
 0x109   : > { %713 = vmatprep.subr.bf16.mxu0 %v1473_v15  ;;  %v1998_v15 = vld [vmem:[%s2202_s2] ss:$0 sm:$0xff] }
 0x10a   : > { %v376_v34 = vmul.f32 %v1975_v12, %v1975_v12  ;;  %v377_v14 = vmul.f32 %v1978_v13, %v1978_v13  ;;  %714 = vmatpush1.bf16.msra.mxu0 %v1476_v36 }
 0x10b   : > { %715 = vmatprep.subr.bf16.mxu0 %v1477_v37 }
 0x10c   : > { %404 = vadd.xlane.f32.xlu1 %v375_v28  ;;  %406 = vadd.xlane.f32.xlu0 %v376_v34 }
 0x10e   : > { %716 = vmatpush1.bf16.msra.mxu0 %v1480_v41 }
 0x10f   : > { %717 = vmatprep.subr.bf16.mxu0 %v1481_v42 }
 0x110   : > { %408 = vadd.xlane.f32.xlu1 %v377_v14 }
 0x112   : > { %718 = vmatpush1.bf16.msra.mxu0 %v1484_v44 }
 0x17d   : > { %v379_v49 = vpop.xlane.xlu0 %378 }
 0x17e   : > { %v410_v50 = vmul.f32 0.0078125, %v379_v49 }
 0x180   : > { %v426_v51 = vadd.f32 1e-05, %v410_v50 }
 0x181   : > { %v381_v52 = vpop.xlane.xlu1 %380  ;;  %v383_v53 = vpop.xlane.xlu0 %382 }
 0x182   : > { %1486 = vrsqrt.f32 %v426_v51  ;;  %v411_v54 = vmul.f32 0.0078125, %v381_v52  ;;  %v412_v57 = vmul.f32 0.0078125, %v383_v53 }
 0x184   : > { %v427_v58 = vadd.f32 1e-05, %v411_v54  ;;  %v428_v59 = vadd.f32 1e-05, %v412_v57 }
 0x185   : > { %v385_v60 = vpop.xlane.xlu1 %384  ;;  %v387_v61 = vpop.xlane.xlu0 %386 }
 0x186   : > { %1488 = vrsqrt.f32 %v427_v58  ;;  %v413_v62 = vmul.f32 0.0078125, %v385_v60  ;;  %v414_v63 = vmul.f32 0.0078125, %v387_v61 }
 0x187   : > { %1490 = vrsqrt.f32 %v428_v59 }
 0x188   : > { %v429_v0 = vadd.f32 1e-05, %v413_v62  ;;  %v430_v1 = vadd.f32 1e-05, %v414_v63 }
 0x189   : > { %v389_v4 = vpop.xlane.xlu1 %388  ;;  %v391_v5 = vpop.xlane.xlu0 %390 }
 0x18a   : > { %1492 = vrsqrt.f32 %v429_v0  ;;  %v415_v6 = vmul.f32 0.0078125, %v389_v4  ;;  %v416_v7 = vmul.f32 0.0078125, %v391_v5 }
 0x18b   : > { %1494 = vrsqrt.f32 %v430_v1 }
 0x18c   : > { %v1487_v8 = vpop.eup %1486  ;;  %v431_v9 = vadd.f32 1e-05, %v415_v6  ;;  %v432_v16 = vadd.f32 1e-05, %v416_v7 }
 0x18d   : > { %v393_v17 = vpop.xlane.xlu1 %392  ;;  %v395_v18 = vpop.xlane.xlu0 %394  ;;  %v458_v19 = vmul.f32 %v1487_v8, %v1913_v24 }
 0x18e   : > { %1496 = vrsqrt.f32 %v431_v9  ;;  %v417_v20 = vmul.f32 0.0078125, %v393_v17  ;;  %v418_v21 = vmul.f32 0.0078125, %v395_v18 }
 0x18f   : > { %1498 = vrsqrt.f32 %v432_v16  ;;  %v480_v34 = vmul.f32 %v1991_v22, %v458_v19 }
 0x190   : > { %v1489_v23 = vpop.eup %1488  ;;  %v433_v26 = vadd.f32 1e-05, %v417_v20  ;;  %v434_v27 = vadd.f32 1e-05, %v418_v21 }
 0x191   : > { %v1491_v28 = vpop.eup %1490  ;;  %v397_v29 = vpop.xlane.xlu1 %396  ;;  %v459_v33 = vmul.f32 %v1489_v23, %v1919_v31  ;;  %v502_v45 = vadd.f32 %v1998_v15, %v480_v34 }
 0x192   : > { %v399_v30 = vpop.xlane.xlu0 %398  ;;  %1500 = vrsqrt.f32 %v433_v26  ;;  %v419_v24 = vmul.f32 0.0078125, %v397_v29  ;;  %v460_v35 = vmul.f32 %v1491_v28, %v1915_v25 }
 0x193   : > { %v420_v14 = vmul.f32 0.0078125, %v399_v30  ;;  %1502 = vrsqrt.f32 %v434_v27  ;;  %v481_v36 = vmul.f32 %v1991_v22, %v459_v33 }
 0x194   : > { %v1493_v37 = vpop.eup %1492  ;;  %v435_v38 = vadd.f32 1e-05, %v419_v24  ;;  %v482_v31 = vmul.f32 %v1991_v22, %v460_v35 }
 0x195   : > { %v436_v41 = vadd.f32 1e-05, %v420_v14  ;;  %v1495_v42 = vpop.eup %1494  ;;  %v401_v43 = vpop.xlane.xlu1 %400  ;;  %v503_v49 = vadd.f32 %v1998_v15, %v481_v36  ;;  %v461_v50 = vmul.f32 %v1493_v37, %v1921_v32 }
 0x196   : > { %v403_v44 = vpop.xlane.xlu0 %402  ;;  %1504 = vrsqrt.f32 %v435_v38  ;;  %v421_v51 = vmul.f32 0.0078125, %v401_v43  ;;  %v462_v54 = vmul.f32 %v1495_v42, %v1927_v39  ;;  %v504_v60 = vadd.f32 %v1998_v15, %v482_v31 }
 0x197   : > { %v422_v25 = vmul.f32 0.0078125, %v403_v44  ;;  %1506 = vrsqrt.f32 %v436_v41  ;;  %v518_v52 = vpack.c.bf16 %v503_v49, %v502_v45  ;;  %v483_v53 = vmul.f32 %v1991_v22, %v461_v50 }
 0x198   : > { %v1497_v57 = vpop.eup %1496  ;;  %v437_v58 = vadd.f32 1e-05, %v421_v51  ;;  %v484_v1 = vmul.f32 %v1991_v22, %v462_v54 }
 0x199   : > { %v438_v59 = vadd.f32 1e-05, %v422_v25  ;;  %v1499_v61 = vpop.eup %1498  ;;  %v405_v62 = vpop.xlane.xlu1 %404  ;;  %736 = vmatmul.mubr.bf16.vlgmr.msra.gmra.mrb[0].mxu0 %v518_v52  ;;  %1356 = vmatprep.mubr.bf16.mxu1 %v518_v52  ;;  %v505_v32 = vadd.f32 %v1998_v15, %v483_v53  ;;  %v463_v0 = vmul.f32 %v1497_v57, %v1929_v40 }
 0x19a   : > { %v407_v63 = vpop.xlane.xlu0 %406  ;;  %1508 = vrsqrt.f32 %v437_v58  ;;  %v423_v4 = vmul.f32 0.0078125, %v405_v62  ;;  %745 = vmatprep.mubr.bf16.mxu0 %v1670_v46  ;;  %v464_v39 = vmul.f32 %v1499_v61, %v1935_v47  ;;  %v506_v19 = vadd.f32 %v1998_v15, %v484_v1 }
 0x19b   : > { %v424_v5 = vmul.f32 0.0078125, %v407_v63  ;;  %1510 = vrsqrt.f32 %v438_v59  ;;  %v519_v6 = vpack.c.bf16 %v505_v32, %v504_v60  ;;  %v485_v7 = vmul.f32 %v1991_v22, %v463_v0 }
 0x19c   : > { %v1501_v8 = vpop.eup %1500  ;;  %v439_v9 = vadd.f32 1e-05, %v423_v4  ;;  %v486_v17 = vmul.f32 %v1991_v22, %v464_v39 }
 0x19d   : > { %v440_v16 = vadd.f32 1e-05, %v424_v5  ;;  %v1503_v18 = vpop.eup %1502  ;;  %v409_v40 = vpop.xlane.xlu1 %408  ;;  %1357 = vmatmul.mubr.bf16.vlgmr.msra.gmra.mrb[0].mxu1 %v519_v6  ;;  %v507_v20 = vadd.f32 %v1998_v15, %v485_v7  ;;  %v465_v21 = vmul.f32 %v1501_v8, %v1938_v48 }
 0x19e   : > { %1512 = vrsqrt.f32 %v439_v9  ;;  %v425_v47 = vmul.f32 0.0078125, %v409_v40  ;;  %v466_v23 = vmul.f32 %v1503_v18, %v1945_v55  ;;  %v508_v30 = vadd.f32 %v1998_v15, %v486_v17 }
 0x19f   : > { %1514 = vrsqrt.f32 %v440_v16  ;;  %v520_v26 = vpack.c.bf16 %v507_v20, %v506_v19  ;;  %v487_v27 = vmul.f32 %v1991_v22, %v465_v21 }
 0x1a0   : > { %v1505_v28 = vpop.eup %1504  ;;  %v441_v29 = vadd.f32 1e-05, %v425_v47  ;;  %v488_v48 = vmul.f32 %v1991_v22, %v466_v23 }
 0x1a1   : > { %v1507_v33 = vpop.eup %1506  ;;  %746 = vmatmul.mubr.bf16.gmra.mrb[4].mxu0 %v519_v6  ;;  %1360 = vmatprep.mubr.bf16.mxu1 %v520_v26  ;;  %v509_v34 = vadd.f32 %v1998_v15, %v487_v27  ;;  %v467_v24 = vmul.f32 %v1505_v28, %v1948_v56 }
 0x1a2   : > { %1516 = vrsqrt.f32 %v441_v29  ;;  %755 = vmatprep.mubr.bf16.mxu0 %v1670_v46  ;;  %v468_v55 = vmul.f32 %v1507_v33, %v1955_v2  ;;  %v510_v41 = vadd.f32 %v1998_v15, %v488_v48 }
 0x1a3   : > { %v521_v14 = vpack.c.bf16 %v509_v34, %v508_v30  ;;  %v489_v35 = vmul.f32 %v1991_v22, %v467_v24 }
 0x1a4   : > { %v1509_v36 = vpop.eup %1508  ;;  %v490_v37 = vmul.f32 %v1991_v22, %v468_v55 }
 0x1a5   : > { %v1511_v38 = vpop.eup %1510  ;;  %1361 = vmatmul.mubr.bf16.gmra.mrb[4].mxu1 %v521_v14  ;;  %v511_v31 = vadd.f32 %v1998_v15, %v489_v35  ;;  %v469_v56 = vmul.f32 %v1509_v36, %v1958_v3 }
 0x1a6   : > { %v470_v42 = vmul.f32 %v1511_v38, %v1965_v10  ;;  %v512_v45 = vadd.f32 %v1998_v15, %v490_v37 }
 0x1a7   : > { %v522_v43 = vpack.c.bf16 %v511_v31, %v510_v41  ;;  %v491_v44 = vmul.f32 %v1991_v22, %v469_v56 }
 0x1a8   : > { %v1513_v2 = vpop.eup %1512  ;;  %v492_v25 = vmul.f32 %v1991_v22, %v470_v42 }
 0x1a9   : > { %v1515_v49 = vpop.eup %1514  ;;  %756 = vmatmul.mubr.bf16.gmra.mrb[8].mxu0 %v520_v26  ;;  %1364 = vmatprep.mubr.bf16.mxu1 %v522_v43  ;;  %v513_v50 = vadd.f32 %v1998_v15, %v491_v44  ;;  %v471_v51 = vmul.f32 %v1513_v2, %v1968_v11 }
 0x1aa   : > { %765 = vmatprep.mubr.bf16.mxu0 %v1670_v46  ;;  %v472_v3 = vmul.f32 %v1515_v49, %v1975_v12  ;;  %v514_v54 = vadd.f32 %v1998_v15, %v492_v25 }
 0x1ab   : > { %v523_v10 = vpack.c.bf16 %v513_v50, %v512_v45  ;;  %v493_v52 = vmul.f32 %v1991_v22, %v471_v51 }
 0x1ac   : > { %v1517_v53 = vpop.eup %1516  ;;  %v494_v59 = vmul.f32 %v1991_v22, %v472_v3 }
 0x1ad   : > { %1365 = vmatmul.mubr.bf16.gmra.mrb[8].mxu1 %v523_v10  ;;  %v515_v57 = vadd.f32 %v1998_v15, %v493_v52  ;;  %v473_v58 = vmul.f32 %v1517_v53, %v1978_v13  ;;  %v560_v13 = vlaneseq }
 0x1ae   : > { %v516_v12 = vadd.f32 %v1998_v15, %v494_v59 }
 0x1af   : > { %v524_v11 = vpack.c.bf16 %v515_v57, %v514_v54  ;;  %v495_v60 = vmul.f32 %v1991_v22, %v473_v58  ;;  %v561_v22 = vshrl.u32 %v560_v13, 7 }
 0x1b1   : > { %766 = vmatmul.mubr.bf16.gmra.mrb[12].mxu0 %v521_v14  ;;  %1368 = vmatprep.mubr.bf16.mxu1 %v524_v11  ;;  %v517_v61 = vadd.f32 %v1998_v15, %v495_v60  ;;  %v562_v63 = vsub.s32 0, %v561_v22  ;;  %v558_v15 = vld [vmem:[%s2204_s4] sm:$0x7]  ;;  %v566_v32 = vsub.s32 1, %v561_v22  ;;  %v570_v1 = vsub.s32 2, %v561_v22 }
 0x1b2   : > { %775 = vmatprep.mubr.bf16.mxu0 %v1670_v46 }
 0x1b3   : > { %v525_v62 = vpack.c.bf16 %v517_v61, %v516_v12  ;;  %v2055_v0 = vrot.slane %v558_v15, %v562_v63  ;;  %v2057_v4 = vrot.slane %v558_v15, %v566_v32 }
 0x1b5   : > { %1369 = vmatmul.mubr.bf16.gmra.mrb[12].mxu1 %v525_v62 }
 0x1b9   : > { %776 = vmatmul.mubr.bf16.gmra.mrb[16].mxu0 %v522_v43 }
 0x1ba   : > { %785 = vmatprep.mubr.bf16.mxu0 %v1670_v46 }
 0x1c1   : > { %786 = vmatmul.mubr.bf16.gmra.mrb[20].mxu0 %v523_v10 }
 0x1c2   : > { %795 = vmatprep.mubr.bf16.mxu0 %v1670_v46 }
 0x1c9   : > { %796 = vmatmul.mubr.bf16.gmra.mrb[24].mxu0 %v524_v11 }
 0x1ca   : > { %805 = vmatprep.mubr.bf16.mxu0 %v1670_v46  ;;  %v2061_v46 = vrot.slane %v558_v15, %v570_v1 }
 0x1d1   : > { %806 = vmatmul.mubr.bf16.gmra.mrb[28].mxu0 %v525_v62 }
 0x26c   : > { %v737_v5 = vpop.f32.mrb[0].mxu0 }
 0x26d   : > { %v738_v39 = vadd.f32 %v737_v5, %v2055_v0  ;;  %v739_v6 = vpop.f32.mrb[1].mxu0 }
 0x26e   : > { %v740_v7 = vadd.f32 %v739_v6, %v2057_v4  ;;  %v741_v8 = vpop.f32.mrb[2].mxu0 }
 0x26f   : > { %v742_v9 = vadd.f32 %v741_v8, %v2055_v0  ;;  %v743_v16 = vpop.f32.mrb[3].mxu0 }
 0x270   : > { %v1292_v17 = vpack.c.bf16 %v740_v7, %v738_v39  ;;  %v744_v18 = vadd.f32 %v743_v16, %v2057_v4  ;;  %v1358_v40 = vpop.f32.mrb[0].mxu1 }
 0x271   : > { %v859_v19 = vadd.f32 %v1358_v40, %v2061_v46  ;;  %v850_v20 = vpop.f32.mrb[1].mxu1 }
 0x272   : > { %1073 = vst [vmem:[%s2067_s14] sm:$0xff] %v1292_v17  ;;  %v1294_v21 = vpack.c.bf16 %v744_v18, %v742_v9  ;;  %v851_v47 = vadd.f32 %v850_v20, %v2061_v46  ;;  %v1359_v23 = vpop.f32.mrb[2].mxu1 }
 0x273   : > { %v1297_v26 = vpack.c.bf16 %v859_v19, %v859_v19  ;;  %v862_v27 = vadd.f32 %v1359_v23, %v2061_v46  ;;  %v853_v28 = vpop.f32.mrb[3].mxu1 }
 0x274   : > { %1075 = vst [vmem:[%s2067_s14 + $0xc] sm:$0xff] %v1294_v21  ;;  %v1293_v29 = vpack.c.bf16 %v851_v47, %v851_v47  ;;  %v854_v30 = vadd.f32 %v853_v28, %v2061_v46  ;;  %v747_v33 = vpop.f32.mrb[4].mxu0 }
 0x275   : > { %1078 = vst [vmem:[%s2067_s14 + $0x20] sm:$0xf] %v1297_v26  ;;  %v1299_v34 = vpack.c.bf16 %v862_v27, %v862_v27  ;;  %v748_v24 = vadd.f32 %v747_v33, %v2055_v0  ;;  %v749_v48 = vpop.f32.mrb[5].mxu0 }
 0x276   : > { %1074 = vst [vmem:[%s2067_s14 + $0x8] sm:$0xf] %v1293_v29  ;;  %v1295_v55 = vpack.c.bf16 %v854_v30, %v854_v30  ;;  %v750_v14 = vadd.f32 %v749_v48, %v2057_v4  ;;  %v751_v35 = vpop.f32.mrb[6].mxu0 }
 0x277   : > { %1080 = vst [vmem:[%s2067_s14 + $0x2c] sm:$0xf] %v1299_v34  ;;  %v752_v36 = vadd.f32 %v751_v35, %v2055_v0  ;;  %v753_v37 = vpop.f32.mrb[7].mxu0 }
 0x278   : > { %1076 = vst [vmem:[%s2067_s14 + $0x14] sm:$0xf] %v1295_v55  ;;  %v1296_v38 = vpack.c.bf16 %v750_v14, %v748_v24  ;;  %v754_v41 = vadd.f32 %v753_v37, %v2057_v4  ;;  %v1362_v31 = vpop.f32.mrb[4].mxu1 }
 0x279   : > { %v875_v56 = vadd.f32 %v1362_v31, %v2061_v46  ;;  %v866_v42 = vpop.f32.mrb[5].mxu1 }
 0x27a   : > { %1077 = vst [vmem:[%s2067_s14 + $0x18] sm:$0xff] %v1296_v38  ;;  %v1298_v43 = vpack.c.bf16 %v754_v41, %v752_v36  ;;  %v867_v44 = vadd.f32 %v866_v42, %v2061_v46  ;;  %v1363_v2 = vpop.f32.mrb[6].mxu1 }
 0x27b   : > { %v1305_v45 = vpack.c.bf16 %v875_v56, %v875_v56  ;;  %v878_v49 = vadd.f32 %v1363_v2, %v2061_v46  ;;  %v869_v50 = vpop.f32.mrb[7].mxu1 }
 0x27c   : > { %1079 = vst [vmem:[%s2067_s14 + $0x24] sm:$0xff] %v1298_v43  ;;  %v1301_v51 = vpack.c.bf16 %v867_v44, %v867_v44  ;;  %v870_v25 = vadd.f32 %v869_v50, %v2061_v46  ;;  %v757_v3 = vpop.f32.mrb[8].mxu0 }
 0x27d   : > { %1086 = vst [vmem:[%s2067_s14 + $0x50] sm:$0xf] %v1305_v45  ;;  %v1307_v10 = vpack.c.bf16 %v878_v49, %v878_v49  ;;  %v758_v52 = vadd.f32 %v757_v3, %v2055_v0  ;;  %v759_v53 = vpop.f32.mrb[9].mxu0 }
 0x27e   : > { %1082 = vst [vmem:[%s2067_s14 + $0x38] sm:$0xf] %v1301_v51  ;;  %v1303_v54 = vpack.c.bf16 %v870_v25, %v870_v25  ;;  %v760_v57 = vadd.f32 %v759_v53, %v2057_v4  ;;  %v761_v58 = vpop.f32.mrb[10].mxu0 }
 0x27f   : > { %1088 = vst [vmem:[%s2067_s14 + $0x5c] sm:$0xf] %v1307_v10  ;;  %v762_v59 = vadd.f32 %v761_v58, %v2055_v0  ;;  %v763_v11 = vpop.f32.mrb[11].mxu0 }
 0x280   : > { %1084 = vst [vmem:[%s2067_s14 + $0x44] sm:$0xf] %v1303_v54  ;;  %v1300_v60 = vpack.c.bf16 %v760_v57, %v758_v52  ;;  %v764_v12 = vadd.f32 %v763_v11, %v2057_v4  ;;  %v1366_v61 = vpop.f32.mrb[8].mxu1 }
 0x281   : > { %v891_v62 = vadd.f32 %v1366_v61, %v2061_v46  ;;  %v882_v13 = vpop.f32.mrb[9].mxu1 }
 0x282   : > { %1081 = vst [vmem:[%s2067_s14 + $0x30] sm:$0xff] %v1300_v60  ;;  %v1302_v22 = vpack.c.bf16 %v764_v12, %v762_v59  ;;  %v883_v63 = vadd.f32 %v882_v13, %v2061_v46  ;;  %v1367_v15 = vpop.f32.mrb[10].mxu1 }
 0x283   : > { %v1313_v32 = vpack.c.bf16 %v891_v62, %v891_v62  ;;  %v894_v1 = vadd.f32 %v1367_v15, %v2061_v46  ;;  %v885_v5 = vpop.f32.mrb[11].mxu1 }
 0x284   : > { %1083 = vst [vmem:[%s2067_s14 + $0x3c] sm:$0xff] %v1302_v22  ;;  %v1309_v39 = vpack.c.bf16 %v883_v63, %v883_v63  ;;  %v886_v6 = vadd.f32 %v885_v5, %v2061_v46  ;;  %v767_v7 = vpop.f32.mrb[12].mxu0 }
 0x285   : > { %1094 = vst [vmem:[%s2067_s14 + $0x80] sm:$0xf] %v1313_v32  ;;  %v1315_v8 = vpack.c.bf16 %v894_v1, %v894_v1  ;;  %v768_v9 = vadd.f32 %v767_v7, %v2055_v0  ;;  %v769_v16 = vpop.f32.mrb[13].mxu0 }
 0x286   : > { %1090 = vst [vmem:[%s2067_s14 + $0x68] sm:$0xf] %v1309_v39  ;;  %v1311_v17 = vpack.c.bf16 %v886_v6, %v886_v6  ;;  %v770_v18 = vadd.f32 %v769_v16, %v2057_v4  ;;  %v771_v40 = vpop.f32.mrb[14].mxu0 }
 0x287   : > { %1096 = vst [vmem:[%s2067_s14 + $0x8c] sm:$0xf] %v1315_v8  ;;  %v772_v19 = vadd.f32 %v771_v40, %v2055_v0  ;;  %v773_v20 = vpop.f32.mrb[15].mxu0 }
 0x288   : > { %1092 = vst [vmem:[%s2067_s14 + $0x74] sm:$0xf] %v1311_v17  ;;  %v1304_v21 = vpack.c.bf16 %v770_v18, %v768_v9  ;;  %v774_v47 = vadd.f32 %v773_v20, %v2057_v4  ;;  %v1370_v23 = vpop.f32.mrb[12].mxu1 }
 0x289   : > { %v907_v26 = vadd.f32 %v1370_v23, %v2061_v46  ;;  %v898_v27 = vpop.f32.mrb[13].mxu1 }
 0x28a   : > { %1085 = vst [vmem:[%s2067_s14 + $0x48] sm:$0xff] %v1304_v21  ;;  %v1306_v28 = vpack.c.bf16 %v774_v47, %v772_v19  ;;  %v899_v29 = vadd.f32 %v898_v27, %v2061_v46  ;;  %v1371_v30 = vpop.f32.mrb[14].mxu1 }
 0x28b   : > { %v1321_v33 = vpack.c.bf16 %v907_v26, %v907_v26  ;;  %v910_v34 = vadd.f32 %v1371_v30, %v2061_v46  ;;  %v901_v24 = vpop.f32.mrb[15].mxu1 }
 0x28c   : > { %1087 = vst [vmem:[%s2067_s14 + $0x54] sm:$0xff] %v1306_v28  ;;  %v1317_v48 = vpack.c.bf16 %v899_v29, %v899_v29  ;;  %v902_v55 = vadd.f32 %v901_v24, %v2061_v46  ;;  %v777_v14 = vpop.f32.mrb[16].mxu0 }
 0x28d   : > { %1102 = vst [vmem:[%s2067_s14 + $0xb0] sm:$0xf] %v1321_v33  ;;  %v1323_v35 = vpack.c.bf16 %v910_v34, %v910_v34  ;;  %v778_v36 = vadd.f32 %v777_v14, %v2055_v0  ;;  %v779_v37 = vpop.f32.mrb[17].mxu0 }
 0x28e   : > { %1098 = vst [vmem:[%s2067_s14 + $0x98] sm:$0xf] %v1317_v48  ;;  %v1319_v38 = vpack.c.bf16 %v902_v55, %v902_v55  ;;  %v780_v41 = vadd.f32 %v779_v37, %v2057_v4  ;;  %v781_v31 = vpop.f32.mrb[18].mxu0 }
 0x28f   : > { %1104 = vst [vmem:[%s2067_s14 + $0xbc] sm:$0xf] %v1323_v35  ;;  %v782_v56 = vadd.f32 %v781_v31, %v2055_v0  ;;  %v783_v42 = vpop.f32.mrb[19].mxu0 }
 0x290   : > { %1100 = vst [vmem:[%s2067_s14 + $0xa4] sm:$0xf] %v1319_v38  ;;  %v1308_v46 = vpack.c.bf16 %v780_v41, %v778_v36  ;;  %v784_v43 = vadd.f32 %v783_v42, %v2057_v4 }
 0x292   : > { %1089 = vst [vmem:[%s2067_s14 + $0x60] sm:$0xff] %v1308_v46  ;;  %v1310_v44 = vpack.c.bf16 %v784_v43, %v782_v56 }
 0x294   : > { %1091 = vst [vmem:[%s2067_s14 + $0x6c] sm:$0xff] %v1310_v44  ;;  %v787_v2 = vpop.f32.mrb[20].mxu0 }
 0x295   : > { %v788_v45 = vadd.f32 %v787_v2, %v2055_v0  ;;  %v789_v49 = vpop.f32.mrb[21].mxu0 }
 0x296   : > { %v790_v50 = vadd.f32 %v789_v49, %v2057_v4  ;;  %v791_v51 = vpop.f32.mrb[22].mxu0 }
 0x297   : > { %v792_v25 = vadd.f32 %v791_v51, %v2055_v0  ;;  %v793_v3 = vpop.f32.mrb[23].mxu0 }
 0x298   : > { %v1312_v10 = vpack.c.bf16 %v790_v50, %v788_v45  ;;  %v794_v52 = vadd.f32 %v793_v3, %v2057_v4 }
 0x29a   : > { %1093 = vst [vmem:[%s2067_s14 + $0x78] sm:$0xff] %v1312_v10  ;;  %v1314_v53 = vpack.c.bf16 %v794_v52, %v792_v25 }
 0x29c   : > { %1095 = vst [vmem:[%s2067_s14 + $0x84] sm:$0xff] %v1314_v53  ;;  %v797_v54 = vpop.f32.mrb[24].mxu0 }
 0x29d   : > { %v798_v57 = vadd.f32 %v797_v54, %v2055_v0  ;;  %v799_v58 = vpop.f32.mrb[25].mxu0 }
 0x29e   : > { %v800_v59 = vadd.f32 %v799_v58, %v2057_v4  ;;  %v801_v11 = vpop.f32.mrb[26].mxu0 }
 0x29f   : > { %v802_v60 = vadd.f32 %v801_v11, %v2055_v0  ;;  %v803_v12 = vpop.f32.mrb[27].mxu0 }
 0x2a0   : > { %v1316_v61 = vpack.c.bf16 %v800_v59, %v798_v57  ;;  %v804_v62 = vadd.f32 %v803_v12, %v2057_v4 }
 0x2a2   : > { %1097 = vst [vmem:[%s2067_s14 + $0x90] sm:$0xff] %v1316_v61  ;;  %v1318_v13 = vpack.c.bf16 %v804_v62, %v802_v60 }
 0x2a4   : > { %1099 = vst [vmem:[%s2067_s14 + $0x9c] sm:$0xff] %v1318_v13  ;;  %v807_v22 = vpop.f32.mrb[28].mxu0 }
 0x2a5   : > { %v808_v63 = vadd.f32 %v807_v22, %v2055_v0  ;;  %v809_v15 = vpop.f32.mrb[29].mxu0 }
 0x2a6   : > { %v810_v32 = vadd.f32 %v809_v15, %v2057_v4  ;;  %v811_v1 = vpop.f32.mrb[30].mxu0 }
 0x2a7   : > { %v812_v5 = vadd.f32 %v811_v1, %v2055_v0  ;;  %v813_v39 = vpop.f32.mrb[31].mxu0 }
 0x2a8   : > { %v1320_v6 = vpack.c.bf16 %v810_v32, %v808_v63  ;;  %v814_v7 = vadd.f32 %v813_v39, %v2057_v4 }
 0x2aa   : > { %1101 = vst [vmem:[%s2067_s14 + $0xa8] sm:$0xff] %v1320_v6  ;;  %v1322_v8 = vpack.c.bf16 %v814_v7, %v812_v5 }
 0x2ac   : > { %1103 = vst [vmem:[%s2067_s14 + $0xb4] sm:$0xff] %v1322_v8 }
 0x2ad   : > { %1589 = shalt.err (!%p1586_p5)
}
 0x2ae   : > { %s1590_s25 = scalar_lea.hbm %s2147_s7, 3072  ;;  %s1594_s11 = scalar_lea.hbm %s2205_s5, 6144 }
 0x2af   : > { %p1591_p9 = scmp.ne.s32.totalorder %s2147_s7, %s1590_s25  ;;  %p1595_p3 = scmp.lt.u32.totalorder %s2147_s7, %s2205_s5 }
 0x2b0   : > { %p1596_p7 = scmp.lt.u32.totalorder %s1594_s11, %s1590_s25  ;;  %p1598_p4 = scmp.lt.u32.totalorder %s1590_s25, %s2147_s7 }
 0x2b1   : > { %p1592_p1 = pnand %p1591_p9, %p1800_p10 }
 0x2b2   : > { %p1597_p13 = por %p1596_p7, %p1595_p3 }
 0x2b3   : > { %p1593_p2 = pneg %p1592_p1 }
 0x2b4   : > { %p1599_p6 = por %p1598_p4, %p1597_p13 }
 0x2b6   : > { %p1600_p8 = pnand %p1599_p6, %p1593_p2 }
 0x2b8   : > { %1603 = shalt.err (!%p1600_p8)
}
 0x2b9   : > { %s1672_s12 = smov 192   ;;  %s1673_s24 = smov 12  }
 0x2ba   : > { %1380 = dma.vmem_to_hbm [thread:$0]  (%p1800_p10), %s2150_s8, 3072, %s2147_s7, %s1106_s21, %s1672_s12, %s1672_s12, %s1673_s24  }
 0x2bb PF: > { %s1137_s27 = sand.u32 1, %s1642_s18   ;;  %p2223_p12 = scmp.ne.s32.totalorder %s2213_s29, 0 }
 0x2bc   : > { %p2224_p11 = scmp.ge.s32.totalorder %s1662_s23, 2  ;;  %s1138_s26 = scalar_lea.sflag [#allocation4], %s1137_s27 }
 0x2be   : > { %p1391_p0 = pnand %p2224_p11, %p2223_p12 }
 0x2c0   : > { %1637 = dma.done.wait (!%p1391_p0), %s1138_s26, 3072  }
 0x2c1   : > { %1639 = vsyncadd (!%p1391_p0), %s1138_s26, 4294964224  ;;  %s22_s23 = sadd.s32 1, %s1662_s23   ;;  %s2225_s18 = smov %s1646_s19 }
 0x2c2   : > { %p19_p5 = scmp.ge.s32.totalorder %s22_s23, 4   ;;  %s2226_s19 = smov %s1650_s20 }
 0x2c3   : > { %s2227_s20 = smov %s1809_s15  ;;  %s2228_s21 = smov %s1658_s22 }
 0x2c4   : > { %s2229_s22 = smov %s2231_s9  ;;  %21 = sbr.rel (!%p19_p5) target bundleno = 7 (0x7), region = 89 }
 0x2cb   :  { %1143 = vsyncpa [#allocation3], 1 }
 0x2cc   :  { %1145 = vsyncpa [#allocation3 + $0x1], 1 }
 0x2cd   :  { %1146 = vsyncpa [#allocation6], 1 }
 0x2ce   :  { %1147 = vsyncpa [#allocation4], 1 }
 0x2cf   :  { %1149 = vsyncpa [#allocation4 + $0x1], 1 }

</bundles_post_ra>
